<compile_context>
chip_gen: v6e
topology: v6e:2x2x1
jax: 0.10.0
libtpu: 0.0.40
codegen_flags: <defaults>
</compile_context>

<pallas_src>
import jax
import jax.numpy as jnp
from jax import lax
from jax.experimental import pallas as pl
from jax.experimental.pallas import tpu as pltpu


def _round_up(n, m):
    return ((n + m - 1) // m) * m


def linear_softmax_kernel(x_ref, w_ref, b_ref, o_ref):
    """One batch tile: o = softmax(x @ w + b, axis=-1).

    x_ref: (TB, D)  streamed activations (bf16 or f32)
    w_ref: (D, O)   resident weights (already transposed in the wrapper -> no XLU op)
    b_ref: (1, O)   resident bias (f32)
    o_ref: (TB, O)  f32 probabilities
    """
    logits = jnp.dot(x_ref[...], w_ref[...],
                     preferred_element_type=jnp.float32)       # MXU, f32 accumulate
    logits = logits + b_ref[...]                               # (TB, O) + (1, O)

    # Numerically stable softmax, full rows per tile -> single pass, f32 epilogue.
    m = jnp.max(logits, axis=-1, keepdims=True)
    e = jnp.exp(logits - m)
    denom = jnp.sum(e, axis=-1, keepdims=True)
    # Exact divide (NOT pl.reciprocal(approx=True)): rows must sum to 1 exactly and
    # the kernel is HBM-bound, so the exact path costs nothing extra.
    o_ref[...] = (e / denom).astype(o_ref.dtype)


# Below this many rows, a single fused XLA op beats pallas_call fixed overhead.
_PALLAS_MIN_BATCH = 1024
# Split a single-tile batch into two grid steps once it is at least this big so the
# "parallel" axis has >= 2 steps to shard across v7x's two TensorCores.
_MEGACORE_SPLIT_ROWS = 2048


def _pick_batch_tile(B, block_b):
    if B > block_b:
        return block_b                        # several full-size tiles
    if B >= _MEGACORE_SPLIT_ROWS:
        return _round_up(pl.cdiv(B, 2), 8)    # exactly 2 steps -> both v7x TCs busy
    return B                                  # one step; overhead-dominated anyway


def my_net_forward(x, weight, bias, *, block_b=8192,
                   stream_dtype=jnp.bfloat16, use_pallas=None):
    """softmax(x @ weight.T + bias, axis=-1), matching my_net.forward.

    x:      (B, D) f32 activations
    weight: (O, D) f32 -- PyTorch nn.Linear layout
    bias:   (O,)   f32
    returns (B, O) f32 probabilities
    """
    B, D = x.shape
    O = weight.shape[0]

    if use_pallas is None:
        use_pallas = B >= _PALLAS_MIN_BATCH
    if not use_pallas:
        # Tiny shapes: pallas_call launch + DMA setup dominates; let XLA fuse it.
        return jax.nn.softmax(x @ weight.T + bias[None, :], axis=-1)

    # Narrow the streamed operands: halves HBM read traffic and is the native MXU
    # input rate on v6e/v7x. Accumulation and the softmax epilogue stay in f32.
    xs = x.astype(stream_dtype)
    w_do = weight.T.astype(stream_dtype)        # one-time (D, O); stays resident in VMEM
    b2 = bias.reshape(1, O).astype(jnp.float32)

    tb = _pick_batch_tile(B, block_b)
    grid = (pl.cdiv(B, tb),)
    # NOTE: if B % tb != 0, padded rows of the last tile may run exp() on stale VMEM;
    # the bounded output writeback keeps valid rows correct (demo shapes divide evenly).

    # VMEM budget from actual buffer sizes (double-buffered streamed tiles + resident
    # weights/bias), with headroom, kept well under v7x's 64 MiB physical VMEM.
    itemsize = jnp.dtype(stream_dtype).itemsize
    tile_bytes = (2 * tb * D * itemsize              # x tiles (double-buffered)
                  + 2 * tb * O * 4                   # out tiles (f32, double-buffered)
                  + 2 * (D * O * itemsize + O * 4))  # weights + bias (conservative x2)
    vmem_limit = int(min(48 * 1024 * 1024,
                         max(16 * 1024 * 1024, 2 * tile_bytes)))

    return pl.pallas_call(
        linear_softmax_kernel,
        out_shape=jax.ShapeDtypeStruct((B, O), jnp.float32),
        grid_spec=pltpu.PrefetchScalarGridSpec(
            num_scalar_prefetch=0,
            grid=grid,
            in_specs=[
                pl.BlockSpec((tb, D), lambda i: (i, 0)),   # activations: streamed per tile
                pl.BlockSpec((D, O), lambda i: (0, 0)),    # weights: same block every step
                pl.BlockSpec((1, O), lambda i: (0, 0)),    # bias: resident
            ],
            out_specs=pl.BlockSpec((tb, O), lambda i: (i, 0)),
        ),
        compiler_params=pltpu.CompilerParams(
            # Batch tiles are independent -> megacore sharding on v7x (no-op on v5e/v6e).
            dimension_semantics=("parallel",),
            vmem_limit_bytes=vmem_limit,
        ),
    )(xs, w_do, b2)


if __name__ == "__main__":
    # Small shapes consistent with the module: vec_dim=32, out_size=16, batch=8.
    batch, vec_dim, out_size = 8, 32, 16

    key = jax.random.PRNGKey(0)
    kx, kw, kb = jax.random.split(key, 3)

    # PyTorch-Linear-style init: U(-1/sqrt(vec_dim), 1/sqrt(vec_dim)).
    bound = 1.0 / (vec_dim ** 0.5)
    weight = jax.random.uniform(kw, (out_size, vec_dim), jnp.float32, -bound, bound)
    bias = jax.random.uniform(kb, (out_size,), jnp.float32, -bound, bound)
    x = jax.random.normal(kx, (batch, vec_dim), jnp.float32)

    # f32 reference of the module's forward.
    ref = jax.nn.softmax(
        jnp.dot(x, weight.T, precision=lax.Precision.HIGHEST) + bias, axis=-1)

    # 1) Pallas path with f32 streaming: faithful to the PyTorch module numerics.
    out_f32 = jax.block_until_ready(
        my_net_forward(x, weight, bias, stream_dtype=jnp.float32, use_pallas=True))
    assert out_f32.shape == (batch, out_size)
    assert jnp.allclose(out_f32, ref, atol=5e-4, rtol=5e-4), "f32 path mismatch vs reference"
    assert jnp.allclose(jnp.sum(out_f32, axis=-1), 1.0, atol=1e-5), "f32 rows must sum to 1"

    # 2) Default perf config: bf16-streamed operands, f32 accumulate + f32 softmax.
    out_bf16 = jax.block_until_ready(my_net_forward(x, weight, bias, use_pallas=True))
    ref_bf16 = jax.nn.softmax(
        jnp.dot(x.astype(jnp.bfloat16), weight.T.astype(jnp.bfloat16),
                preferred_element_type=jnp.float32) + bias, axis=-1)
    assert jnp.allclose(out_bf16, ref_bf16, atol=1e-5, rtol=1e-5), "bf16 path mismatch"
    assert jnp.allclose(out_bf16, ref, atol=2e-2, rtol=2e-2), "bf16 path drifted from module"
    assert jnp.allclose(jnp.sum(out_bf16, axis=-1), 1.0, atol=1e-5), "bf16 rows must sum to 1"

    # 3) Multi-step grid: exercises the batch tiling / two-step megacore split.
    big_b = 4096
    xb = jax.random.normal(jax.random.PRNGKey(1), (big_b, vec_dim), jnp.float32)
    out_big = jax.block_until_ready(my_net_forward(xb, weight, bias))
    ref_big = jax.nn.softmax(
        jnp.dot(xb.astype(jnp.bfloat16), weight.T.astype(jnp.bfloat16),
                preferred_element_type=jnp.float32) + bias, axis=-1)
    assert out_big.shape == (big_b, out_size)
    assert jnp.allclose(out_big, ref_big, atol=1e-5, rtol=1e-5), "tiled path mismatch"
    assert jnp.allclose(jnp.sum(out_big, axis=-1), 1.0, atol=1e-5), "tiled rows must sum to 1"

    print("KERNEL_OK")
</pallas_src>

<mosaic_0001>
module attributes {stable_mosaic.version = 11 : i64} {
  func.func @linear_softmax_kernel(%arg0: i32, %arg1: memref<8x32xf32, #tpu.memory_space<vmem>>, %arg2: memref<32x16xf32, #tpu.memory_space<vmem>>, %arg3: memref<1x16xf32, #tpu.memory_space<vmem>>, %arg4: memref<8x16xf32, #tpu.memory_space<vmem>>) attributes {dimension_semantics = [#tpu.dimension_semantics<parallel>], iteration_bounds = array<i64: 1>, scalar_prefetch = 0 : i64, scratch_operands = 0 : i64, tpu.core_type = #tpu.core_type<tc>, window_params = [{transform_indices = @transform_0, window_bounds = array<i64: 8, 32>}, {pipeline_mode = #tpu.pipeline_mode<synchronous>, transform_indices = @transform_1, window_bounds = array<i64: 32, 16>}, {pipeline_mode = #tpu.pipeline_mode<synchronous>, transform_indices = @transform_2, window_bounds = array<i64: 1, 16>}, {transform_indices = @transform_3, window_bounds = array<i64: 8, 16>}]} {
    %c0 = arith.constant 0 : index
    %c0_0 = arith.constant 0 : index
    %0 = vector.load %arg1[%c0, %c0_0] : memref<8x32xf32, #tpu.memory_space<vmem>>, vector<8x32xf32>
    %c0_1 = arith.constant 0 : index
    %c0_2 = arith.constant 0 : index
    %1 = vector.load %arg2[%c0_1, %c0_2] : memref<32x16xf32, #tpu.memory_space<vmem>>, vector<32x16xf32>
    %cst = arith.constant dense<0.000000e+00> : vector<8x16xf32>
    %2 = tpu.matmul %0, %1, %cst {dimension_numbers = #tpu.dot_dimension_numbers<[1], [0], [0], [1], [0, 0, 1, 1], [], []>} : vector<8x32xf32>, vector<32x16xf32>, vector<8x16xf32> -> vector<8x16xf32>
    %c0_3 = arith.constant 0 : index
    %c0_4 = arith.constant 0 : index
    %3 = vector.load %arg3[%c0_3, %c0_4] : memref<1x16xf32, #tpu.memory_space<vmem>>, vector<1x16xf32>
    %4 = vector.broadcast %3 : vector<1x16xf32> to vector<8x16xf32>
    %5 = arith.addf %2, %4 : vector<8x16xf32>
    %cst_5 = arith.constant dense<0xFF800000> : vector<8xf32>
    %6 = vector.multi_reduction <maximumf>, %5, %cst_5 [1] : vector<8x16xf32> to vector<8xf32>
    %7 = vector.shape_cast %6 : vector<8xf32> to vector<8x1xf32>
    %8 = vector.broadcast %7 : vector<8x1xf32> to vector<8x16xf32>
    %9 = arith.subf %5, %8 : vector<8x16xf32>
    %10 = math.exp %9 : vector<8x16xf32>
    %cst_6 = arith.constant dense<0.000000e+00> : vector<8xf32>
    %11 = vector.multi_reduction <add>, %10, %cst_6 [1] : vector<8x16xf32> to vector<8xf32>
    %12 = vector.shape_cast %11 : vector<8xf32> to vector<8x1xf32>
    %13 = vector.broadcast %12 : vector<8x1xf32> to vector<8x16xf32>
    %14 = arith.divf %10, %13 : vector<8x16xf32>
    %c0_7 = arith.constant 0 : index
    %c0_8 = arith.constant 0 : index
    %15 = vector.load %arg4[%c0_7, %c0_8] : memref<8x16xf32, #tpu.memory_space<vmem>>, vector<8x16xf32>
    tpu.vector_store %arg4[%c0_7, %c0_8], %14 {strides = array<i32>} : memref<8x16xf32, #tpu.memory_space<vmem>>, vector<8x16xf32>,
    return
  }
  func.func @transform_0(%arg0: i32) -> (i32, i32) {
    %c0_i32 = arith.constant 0 : i32
    %c0_i32_0 = arith.constant 0 : i32
    return %arg0, %c0_i32 : i32, i32
  }
  func.func @transform_1(%arg0: i32) -> (i32, i32) {
    %c0_i32 = arith.constant 0 : i32
    %c0_i32_0 = arith.constant 0 : i32
    %c0_i32_1 = arith.constant 0 : i32
    return %c0_i32, %c0_i32_0 : i32, i32
  }
  func.func @transform_2(%arg0: i32) -> (i32, i32) {
    %c0_i32 = arith.constant 0 : i32
    %c0_i32_0 = arith.constant 0 : i32
    %c0_i32_1 = arith.constant 0 : i32
    return %c0_i32, %c0_i32_0 : i32, i32
  }
  func.func @transform_3(%arg0: i32) -> (i32, i32) {
    %c0_i32 = arith.constant 0 : i32
    %c0_i32_0 = arith.constant 0 : i32
    return %arg0, %c0_i32 : i32, i32
  }
}

</mosaic_0001>

<bundles_post_ra>
// kernel: tpu_custom_call.1
= control target key start
LH: loop header
LB: loop body
LE: loop exit
PB: predicated region body
PF: predicated region fallthrough
CT: control target
= control target key end

     0   :  { %v175_v1 = vmov 0.0   ;;  %vm176_vm0 = vmmov 0   ;;  %s222_s0 = inlined_call_operand.vmem [shape: f32[8,32], index: 0, kind: input, shape index: {}]   ;;  %s223_s1 = inlined_call_operand.vmem [shape: f32[32,16], index: 1, kind: input, shape index: {}]   ;;  %s224_s2 = inlined_call_operand.vmem [shape: f32[1,16], index: 2, kind: input, shape index: {}]   ;;  %s225_s3 = inlined_call_operand.hbm [shape: f32[8,16], index: 3, kind: output, shape index: {}]  }
   0x1   :  { %v19_v0 = vld [vmem:[%s223_s1 + $0x18] sm:$0xff]  ;;  %135 = vmatprep.subr.mxu0 %v175_v1  ;;  %v18_v2 = vld [vmem:[%s223_s1 + $0x10] sm:$0xff]  ;;  %143 = vmatprep.mubr.msk.f32.mxu0 %vm176_vm0, %v175_v1 }
   0x2   :  { %136 = vmatpush3.msra.mxu0 %v19_v0 }
   0x3   :  { %8 = vsyncpa [#allocation3], 0  ;;  %137 = vmatprep.subr.mxu0 %v175_v1  ;;  %v17_v3 = vld [vmem:[%s223_s1 + $0x8] sm:$0xff]  ;;  %v16_v4 = vld [vmem:[%s223_s1] sm:$0xff]  ;;  %vm27_vm1 = vcmask 261120   ;;  %vm101_vm2 = vcmask 130048  }
   0x4   :  { %138 = vmatpush3.msra.mxu0 %v18_v2  ;;  %v15_v5 = vld [vmem:[%s222_s0] sm:$0xff]  ;;  %s177_s0 = smov [#allocation2]  }
   0x5   :  { %139 = vmatprep.subr.mxu0 %v175_v1  ;;  %v128_v6 = vld [vmem:[%s224_s2] ss:$0 sm:$0xff]  ;;  %s120_s1 = sshll.u32 %s177_s0, 4  ;;  %s121_s1 = int_to_ptr.vmem [resolvable:$true] %s120_s1 }
   0x6   :  { %140 = vmatpush3.msra.mxu0 %v17_v3  ;;  %s153_s2 = scalar_lea.vmem %s121_s1, 128  ;;  %p158_p1 = scmp.lt.s32.totalorder %s121_s1, %s121_s1 }
   0x7   :  { %141 = vmatprep.subr.mxu0 %v175_v1  ;;  %p154_p0 = scmp.ne.s32.totalorder %s121_s1, %s153_s2  ;;  %p159_p2 = scmp.lt.s32.totalorder %s153_s2, %s153_s2 }
   0x8   :  { %142 = vmatpush3.msra.mxu0 %v16_v4 }
   0x9   :  { %144 = vmatmul.mubr.msk.f32.vlgmr.msra.gmra.mxu0 %vm27_vm1, %v15_v5  ;;  %p160_p3 = por %p159_p2, %p158_p1 }
   0xb   :  { %p161_p4 = pnand %p160_p3, %p154_p0 }
  0xc9   :  { %v97_v7 = vpop.f32.mrf.mxu0 }
  0xca   :  { %v98_v8 = vadd.f32 %v128_v6, %v97_v7 }
  0xcb   :  { %v145_v9 = vpop.f32.mrf.mxu0 }
  0xcc   :  { %v102_v10 = vsel %vm101_vm2, %v98_v8, -inf }
  0xcd   :  { %103 = vmax.xlane.f32.xlu0 %v102_v10 }
 0x156   :  { %v104_v11 = vpop.xlane.xlu0 %103 }
 0x157   :  { %v105_v12 = vsub.f32 %v98_v8, %v104_v11 }
 0x159   :  { %v106_v13 = vmul.f32 1.442695, %v105_v12 }
 0x15b   :  { %149 = vpow2.f32 %v106_v13 }
 0x168   :  { %v150_v14 = vpop.eup %149 }
 0x169   :  { %v108_v15 = vsel %vm101_vm2, %v150_v14, 0.0 }
 0x16a   :  { %109 = vadd.xlane.f32.xlu0 %v108_v15 }
 0x1f3   :  { %v110_v16 = vpop.xlane.xlu0 %109 }
 0x1f4   :  { %151 = vrcp.f32 %v110_v16 }
 0x201   :  { %v152_v17 = vpop.eup %151 }
 0x202   :  { %v112_v18 = vmul.f32 %v152_v17, %v150_v14 }
 0x204   :  { %113 = vst.msk [vmem:[#allocation2] sm:$0xff] %vm101_vm2, %v112_v18 }
 0x205   :  { %164 = shalt.err (!%p161_p4)
}
 0x206   :  { %123 = dma.vmem_to_hbm [thread:$0]  %s121_s1, 128, %s225_s3, [#allocation3]  }
 0x207   :  { %173 = dma.done.wait [#allocation3], 128  }
 0x208   :  { %174 = vsyncadd [#allocation3], 4294967168 }
 0x209   :  { %127 = vsyncpa [#allocation3], 1 }

</bundles_post_ra>
